<compile_context>
chip_gen: v5e
topology: v5e:2x2
jax: 0.10.0
libtpu: 0.0.40
codegen_flags: <defaults>
</compile_context>

<pallas_src>
import functools

import jax
import jax.numpy as jnp
from jax.experimental import pallas as pl
from jax.experimental.pallas import tpu as pltpu

BN_EPS = 1e-5


# --------------------------------------------------------------------------
# Pass 1: tiled matmul + per-column sum / sum-of-squares
# --------------------------------------------------------------------------
def _matmul_stats_kernel(x_ref, w_ref, y_ref, sum_ref, sq_ref, acc_ref):
    # grid = (j over Out tiles, i over B tiles, k over In tiles)
    i = pl.program_id(1)
    k = pl.program_id(2)
    nk = pl.num_programs(2)

    @pl.when(k == 0)
    def _():
        acc_ref[...] = jnp.zeros_like(acc_ref)

    acc_ref[...] += jnp.dot(
        x_ref[...], w_ref[...], preferred_element_type=jnp.float32
    )

    # Initialize the per-column stats accumulator on the first B tile of
    # this Out tile (stats output block index depends only on j).
    @pl.when(jnp.logical_and(k == nk - 1, i == 0))
    def _():
        sum_ref[...] = jnp.zeros_like(sum_ref)
        sq_ref[...] = jnp.zeros_like(sq_ref)

    @pl.when(k == nk - 1)
    def _():
        y = acc_ref[...]
        y_ref[...] = y
        sum_ref[...] += jnp.sum(y, axis=0, keepdims=True)
        sq_ref[...] += jnp.sum(y * y, axis=0, keepdims=True)


# --------------------------------------------------------------------------
# Pass 2: BatchNorm (training mode, batch statistics) + ReLU
# --------------------------------------------------------------------------
def _bn_relu_kernel(y_ref, sum_ref, sq_ref, gamma_ref, beta_ref, o_ref,
                    *, inv_b, eps):
    y = y_ref[...]
    mean = sum_ref[...] * inv_b                        # (1, tn)
    var = sq_ref[...] * inv_b - mean * mean            # biased variance
    var = jnp.maximum(var, 0.0)                        # fp-cancellation guard
    scale = gamma_ref[...] * jax.lax.rsqrt(var + eps)
    shift = beta_ref[...] - mean * scale
    o_ref[...] = jnp.maximum(y * scale + shift, 0.0).astype(o_ref.dtype)


# --------------------------------------------------------------------------
# Wrapper
# --------------------------------------------------------------------------
def _round_up(v, m):
    return ((v + m - 1) // m) * m


def _pick_tile(dim, candidates):
    for c in candidates:
        if dim % c == 0:
            return c
    return dim


def linear_bn_relu(x, weight_io, bias, gamma, beta):
    """Fused Linear -> BatchNorm1d(training) -> ReLU.

    x:         (B, In)   float32
    weight_io: (In, Out) float32  (stored pre-transposed at init)
    bias:      (Out,)    accepted for API parity; under training-mode BN the
                         per-column bias is exactly cancelled by the batch-mean
                         subtraction, so the kernel does not consume it.
    gamma/beta:(Out,)    BatchNorm affine parameters.
    """
    del bias  # mathematically a no-op under training-mode BatchNorm

    B, In = x.shape
    In_w, Out = weight_io.shape
    assert In_w == In, "weight must be (In, Out)"

    # ---- pad to lane-/tile-friendly shapes --------------------------------
    Out_p = _round_up(Out, 128)            # lane-dense output stores
    In_p = _round_up(In, 128)
    if B >= 128:
        B_p = _round_up(B, 128)
        tm = _pick_tile(B_p, (256, 128))
    else:
        B_p = _round_up(B, 8)
        tm = B_p
    tn = _pick_tile(Out_p, (512, 256, 128))
    tk = _pick_tile(In_p, (512, 256, 128))

    x_p = x if (B_p == B and In_p == In) else jnp.pad(
        x, ((0, B_p - B), (0, In_p - In)))
    w_p = weight_io if (In_p == In and Out_p == Out) else jnp.pad(
        weight_io, ((0, In_p - In), (0, Out_p - Out)))
    g_p = jnp.pad(gamma, (0, Out_p - Out)).reshape(1, Out_p)
    be_p = jnp.pad(beta, (0, Out_p - Out)).reshape(1, Out_p)

    nj, ni, nk = Out_p // tn, B_p // tm, In_p // tk

    # ---- pass 1: matmul + per-column sum / sumsq --------------------------
    # Zero-padded batch rows contribute 0 to both sums, and the mean/var are
    # divided by the *real* B in pass 2, so padding does not perturb the stats.
    y_p, col_sum, col_sq = pl.pallas_call(
        _matmul_stats_kernel,
        out_shape=(
            jax.ShapeDtypeStruct((B_p, Out_p), jnp.float32),
            jax.ShapeDtypeStruct((1, Out_p), jnp.float32),
            jax.ShapeDtypeStruct((1, Out_p), jnp.float32),
        ),
        grid_spec=pltpu.PrefetchScalarGridSpec(
            num_scalar_prefetch=0,
            grid=(nj, ni, nk),
            in_specs=[
                pl.BlockSpec((tm, tk), lambda j, i, k: (i, k)),   # x
                pl.BlockSpec((tk, tn), lambda j, i, k: (k, j)),   # W (In, Out)
            ],
            out_specs=(
                pl.BlockSpec((tm, tn), lambda j, i, k: (i, j)),   # Y
                pl.BlockSpec((1, tn), lambda j, i, k: (0, j)),    # col sum
                pl.BlockSpec((1, tn), lambda j, i, k: (0, j)),    # col sumsq
            ),
            scratch_shapes=[pltpu.VMEM((tm, tn), jnp.float32)],
        ),
        compiler_params=pltpu.CompilerParams(
            dimension_semantics=("parallel", "arbitrary", "arbitrary")),
    )(x_p, w_p)

    # ---- pass 2: BN (batch stats) + ReLU -----------------------------------
    kern2 = functools.partial(_bn_relu_kernel, inv_b=1.0 / B, eps=BN_EPS)
    out_p = pl.pallas_call(
        kern2,
        out_shape=jax.ShapeDtypeStruct((B_p, Out_p), jnp.float32),
        grid_spec=pltpu.PrefetchScalarGridSpec(
            num_scalar_prefetch=0,
            grid=(ni, nj),
            in_specs=[
                pl.BlockSpec((tm, tn), lambda i, j: (i, j)),      # Y
                pl.BlockSpec((1, tn), lambda i, j: (0, j)),       # col sum
                pl.BlockSpec((1, tn), lambda i, j: (0, j)),       # col sumsq
                pl.BlockSpec((1, tn), lambda i, j: (0, j)),       # gamma
                pl.BlockSpec((1, tn), lambda i, j: (0, j)),       # beta
            ],
            out_specs=pl.BlockSpec((tm, tn), lambda i, j: (i, j)),
        ),
        compiler_params=pltpu.CompilerParams(
            dimension_semantics=("parallel", "parallel")),
    )(y_p, col_sum, col_sq, g_p, be_p)

    return out_p[:B, :Out]


def init_params(key, inputs, outputs, std_dev=0.001):
    """Mirrors init_layer(use_xavier=True) + BatchNorm1d defaults.

    The linear weight is stored pre-transposed as (In, Out) so the forward pass
    never pays a per-call transpose.
    """
    kw, kb = jax.random.split(key)
    xavier_std = jnp.sqrt(2.0 / (inputs + outputs))
    weight_io = jax.random.normal(kw, (inputs, outputs), jnp.float32) * xavier_std
    bias = jax.random.normal(kb, (outputs,), jnp.float32) * std_dev
    gamma = jnp.ones((outputs,), jnp.float32)    # BN weight
    beta = jnp.zeros((outputs,), jnp.float32)    # BN bias
    return weight_io, bias, gamma, beta


if __name__ == "__main__":
    key = jax.random.PRNGKey(0)
    kx, kp = jax.random.split(key)

    B, IN, OUT = 8, 32, 16
    x = jax.random.normal(kx, (B, IN), jnp.float32)
    weight_io, bias, gamma, beta = init_params(kp, IN, OUT)

    fwd = jax.jit(linear_bn_relu)
    out = jax.block_until_ready(fwd(x, weight_io, bias, gamma, beta))

    # Pure-JAX reference (includes the bias; the kernel drops it because
    # training-mode BN mean-subtraction cancels it exactly).
    y_ref = jnp.dot(x, weight_io, precision=jax.lax.Precision.HIGHEST) + bias
    mu = y_ref.mean(axis=0, keepdims=True)
    var = ((y_ref - mu) ** 2).mean(axis=0, keepdims=True)   # biased variance
    y_ref = (y_ref - mu) / jnp.sqrt(var + BN_EPS) * gamma + beta
    y_ref = jnp.maximum(y_ref, 0.0)

    assert out.shape == (B, OUT)
    assert jnp.allclose(out, y_ref, atol=1e-4, rtol=1e-4), "mismatch vs reference"

    print("KERNEL_OK")
</pallas_src>

<mosaic_0001>
module attributes {stable_mosaic.version = 11 : i64} {
  func.func @_matmul_stats_kernel(%arg0: i32, %arg1: i32, %arg2: i32, %arg3: memref<8x128xf32, #tpu.memory_space<vmem>>, %arg4: memref<128x128xf32, #tpu.memory_space<vmem>>, %arg5: memref<8x128xf32, #tpu.memory_space<vmem>>, %arg6: memref<1x128xf32, #tpu.memory_space<vmem>>, %arg7: memref<1x128xf32, #tpu.memory_space<vmem>>, %arg8: memref<8x128xf32, #tpu.memory_space<vmem>>) attributes {dimension_semantics = [#tpu.dimension_semantics<parallel>, #tpu.dimension_semantics<arbitrary>, #tpu.dimension_semantics<arbitrary>], iteration_bounds = array<i64: 1, 1, 1>, scalar_prefetch = 0 : i64, scratch_operands = 1 : i64, tpu.core_type = #tpu.core_type<tc>, window_params = [{transform_indices = @transform_0, window_bounds = array<i64: 8, 128>}, {transform_indices = @transform_1, window_bounds = array<i64: 128, 128>}, {transform_indices = @transform_2, window_bounds = array<i64: 8, 128>}, {transform_indices = @transform_3, window_bounds = array<i64: 1, 128>}, {transform_indices = @transform_4, window_bounds = array<i64: 1, 128>}]} {
    %c0_i32 = arith.constant 0 : i32
    %0 = arith.cmpi eq, %arg2, %c0_i32 : i32
    %1 = arith.extui %0 : i1 to i32
    %c0_i32_0 = arith.constant 0 : i32
    %2 = arith.cmpi ne, %1, %c0_i32_0 : i32
    scf.if %2 {
      %cst_13 = arith.constant 0.000000e+00 : f32
      %17 = vector.broadcast %cst_13 : f32 to vector<8x128xf32>
      %c0_14 = arith.constant 0 : index
      %c0_15 = arith.constant 0 : index
      %18 = vector.load %arg8[%c0_14, %c0_15] : memref<8x128xf32, #tpu.memory_space<vmem>>, vector<8x128xf32>
      tpu.vector_store %arg8[%c0_14, %c0_15], %17 {strides = array<i32>} : memref<8x128xf32, #tpu.memory_space<vmem>>, vector<8x128xf32>,
    } else {
    }
    %c0 = arith.constant 0 : index
    %c0_1 = arith.constant 0 : index
    %3 = vector.load %arg8[%c0, %c0_1] : memref<8x128xf32, #tpu.memory_space<vmem>>, vector<8x128xf32>
    %c0_2 = arith.constant 0 : index
    %c0_3 = arith.constant 0 : index
    %4 = vector.load %arg3[%c0_2, %c0_3] : memref<8x128xf32, #tpu.memory_space<vmem>>, vector<8x128xf32>
    %c0_4 = arith.constant 0 : index
    %c0_5 = arith.constant 0 : index
    %5 = vector.load %arg4[%c0_4, %c0_5] : memref<128x128xf32, #tpu.memory_space<vmem>>, vector<128x128xf32>
    %cst = arith.constant dense<0.000000e+00> : vector<8x128xf32>
    %6 = tpu.matmul %4, %5, %cst {dimension_numbers = #tpu.dot_dimension_numbers<[1], [0], [0], [1], [0, 0, 1, 1], [], []>} : vector<8x128xf32>, vector<128x128xf32>, vector<8x128xf32> -> vector<8x128xf32>
    %7 = arith.addf %3, %6 : vector<8x128xf32>
    %c0_6 = arith.constant 0 : index
    %c0_7 = arith.constant 0 : index
    %8 = vector.load %arg8[%c0_6, %c0_7] : memref<8x128xf32, #tpu.memory_space<vmem>>, vector<8x128xf32>
    tpu.vector_store %arg8[%c0_6, %c0_7], %7 {strides = array<i32>} : memref<8x128xf32, #tpu.memory_space<vmem>>, vector<8x128xf32>,
    %c0_i32_8 = arith.constant 0 : i32
    %9 = arith.cmpi eq, %arg2, %c0_i32_8 : i32
    %c0_i32_9 = arith.constant 0 : i32
    %10 = arith.cmpi eq, %arg1, %c0_i32_9 : i32
    %11 = arith.andi %9, %10 : i1
    %12 = arith.extui %11 : i1 to i32
    %c0_i32_10 = arith.constant 0 : i32
    %13 = arith.cmpi ne, %12, %c0_i32_10 : i32
    scf.if %13 {
      %cst_13 = arith.constant 0.000000e+00 : f32
      %17 = vector.broadcast %cst_13 : f32 to vector<1x128xf32>
      %c0_14 = arith.constant 0 : index
      %c0_15 = arith.constant 0 : index
      %18 = vector.load %arg6[%c0_14, %c0_15] : memref<1x128xf32, #tpu.memory_space<vmem>>, vector<1x128xf32>
      tpu.vector_store %arg6[%c0_14, %c0_15], %17 {strides = array<i32>} : memref<1x128xf32, #tpu.memory_space<vmem>>, vector<1x128xf32>,
      %cst_16 = arith.constant 0.000000e+00 : f32
      %19 = vector.broadcast %cst_16 : f32 to vector<1x128xf32>
      %c0_17 = arith.constant 0 : index
      %c0_18 = arith.constant 0 : index
      %20 = vector.load %arg7[%c0_17, %c0_18] : memref<1x128xf32, #tpu.memory_space<vmem>>, vector<1x128xf32>
      tpu.vector_store %arg7[%c0_17, %c0_18], %19 {strides = array<i32>} : memref<1x128xf32, #tpu.memory_space<vmem>>, vector<1x128xf32>,
    } else {
    }
    %c0_i32_11 = arith.constant 0 : i32
    %14 = arith.cmpi eq, %arg2, %c0_i32_11 : i32
    %15 = arith.extui %14 : i1 to i32
    %c0_i32_12 = arith.constant 0 : i32
    %16 = arith.cmpi ne, %15, %c0_i32_12 : i32
    scf.if %16 {
      %c0_13 = arith.constant 0 : index
      %c0_14 = arith.constant 0 : index
      %17 = vector.load %arg8[%c0_13, %c0_14] : memref<8x128xf32, #tpu.memory_space<vmem>>, vector<8x128xf32>
      %c0_15 = arith.constant 0 : index
      %c0_16 = arith.constant 0 : index
      %18 = vector.load %arg5[%c0_15, %c0_16] : memref<8x128xf32, #tpu.memory_space<vmem>>, vector<8x128xf32>
      tpu.vector_store %arg5[%c0_15, %c0_16], %17 {strides = array<i32>} : memref<8x128xf32, #tpu.memory_space<vmem>>, vector<8x128xf32>,
      %c0_17 = arith.constant 0 : index
      %c0_18 = arith.constant 0 : index
      %19 = vector.load %arg6[%c0_17, %c0_18] : memref<1x128xf32, #tpu.memory_space<vmem>>, vector<1x128xf32>
      %cst_19 = arith.constant dense<0.000000e+00> : vector<128xf32>
      %20 = vector.multi_reduction <add>, %17, %cst_19 [0] : vector<8x128xf32> to vector<128xf32>
      %21 = vector.shape_cast %20 : vector<128xf32> to vector<1x128xf32>
      %22 = arith.addf %19, %21 : vector<1x128xf32>
      %c0_20 = arith.constant 0 : index
      %c0_21 = arith.constant 0 : index
      %23 = vector.load %arg6[%c0_20, %c0_21] : memref<1x128xf32, #tpu.memory_space<vmem>>, vector<1x128xf32>
      tpu.vector_store %arg6[%c0_20, %c0_21], %22 {strides = array<i32>} : memref<1x128xf32, #tpu.memory_space<vmem>>, vector<1x128xf32>,
      %c0_22 = arith.constant 0 : index
      %c0_23 = arith.constant 0 : index
      %24 = vector.load %arg7[%c0_22, %c0_23] : memref<1x128xf32, #tpu.memory_space<vmem>>, vector<1x128xf32>
      %25 = arith.mulf %17, %17 : vector<8x128xf32>
      %cst_24 = arith.constant dense<0.000000e+00> : vector<128xf32>
      %26 = vector.multi_reduction <add>, %25, %cst_24 [0] : vector<8x128xf32> to vector<128xf32>
      %27 = vector.shape_cast %26 : vector<128xf32> to vector<1x128xf32>
      %28 = arith.addf %24, %27 : vector<1x128xf32>
      %c0_25 = arith.constant 0 : index
      %c0_26 = arith.constant 0 : index
      %29 = vector.load %arg7[%c0_25, %c0_26] : memref<1x128xf32, #tpu.memory_space<vmem>>, vector<1x128xf32>
      tpu.vector_store %arg7[%c0_25, %c0_26], %28 {strides = array<i32>} : memref<1x128xf32, #tpu.memory_space<vmem>>, vector<1x128xf32>,
    } else {
    }
    return
  }
  func.func @transform_0(%arg0: i32, %arg1: i32, %arg2: i32) -> (i32, i32) {
    %c0_i32 = arith.constant 0 : i32
    return %arg1, %arg2 : i32, i32
  }
  func.func @transform_1(%arg0: i32, %arg1: i32, %arg2: i32) -> (i32, i32) {
    %c0_i32 = arith.constant 0 : i32
    return %arg2, %arg0 : i32, i32
  }
  func.func @transform_2(%arg0: i32, %arg1: i32, %arg2: i32) -> (i32, i32) {
    %c0_i32 = arith.constant 0 : i32
    return %arg1, %arg0 : i32, i32
  }
  func.func @transform_3(%arg0: i32, %arg1: i32, %arg2: i32) -> (i32, i32) {
    %c0_i32 = arith.constant 0 : i32
    %c0_i32_0 = arith.constant 0 : i32
    return %c0_i32, %arg0 : i32, i32
  }
  func.func @transform_4(%arg0: i32, %arg1: i32, %arg2: i32) -> (i32, i32) {
    %c0_i32 = arith.constant 0 : i32
    %c0_i32_0 = arith.constant 0 : i32
    return %c0_i32, %arg0 : i32, i32
  }
}

module attributes {stable_mosaic.version = 11 : i64} {
  func.func @_bn_relu_kernel(%arg0: i32, %arg1: i32, %arg2: memref<8x128xf32, #tpu.memory_space<vmem>>, %arg3: memref<1x128xf32, #tpu.memory_space<vmem>>, %arg4: memref<1x128xf32, #tpu.memory_space<vmem>>, %arg5: memref<1x128xf32, #tpu.memory_space<vmem>>, %arg6: memref<1x128xf32, #tpu.memory_space<vmem>>, %arg7: memref<8x128xf32, #tpu.memory_space<vmem>>) attributes {dimension_semantics = [#tpu.dimension_semantics<parallel>, #tpu.dimension_semantics<parallel>], iteration_bounds = array<i64: 1, 1>, scalar_prefetch = 0 : i64, scratch_operands = 0 : i64, tpu.core_type = #tpu.core_type<tc>, window_params = [{transform_indices = @transform_0, window_bounds = array<i64: 8, 128>}, {transform_indices = @transform_1, window_bounds = array<i64: 1, 128>}, {transform_indices = @transform_2, window_bounds = array<i64: 1, 128>}, {transform_indices = @transform_3, window_bounds = array<i64: 1, 128>}, {transform_indices = @transform_4, window_bounds = array<i64: 1, 128>}, {transform_indices = @transform_5, window_bounds = array<i64: 8, 128>}]} {
    %c0 = arith.constant 0 : index
    %c0_0 = arith.constant 0 : index
    %0 = vector.load %arg2[%c0, %c0_0] : memref<8x128xf32, #tpu.memory_space<vmem>>, vector<8x128xf32>
    %c0_1 = arith.constant 0 : index
    %c0_2 = arith.constant 0 : index
    %1 = vector.load %arg3[%c0_1, %c0_2] : memref<1x128xf32, #tpu.memory_space<vmem>>, vector<1x128xf32>
    %cst = arith.constant 1.250000e-01 : f32
    %2 = vector.broadcast %cst : f32 to vector<1x128xf32>
    %3 = arith.mulf %1, %2 : vector<1x128xf32>
    %c0_3 = arith.constant 0 : index
    %c0_4 = arith.constant 0 : index
    %4 = vector.load %arg4[%c0_3, %c0_4] : memref<1x128xf32, #tpu.memory_space<vmem>>, vector<1x128xf32>
    %cst_5 = arith.constant 1.250000e-01 : f32
    %5 = vector.broadcast %cst_5 : f32 to vector<1x128xf32>
    %6 = arith.mulf %4, %5 : vector<1x128xf32>
    %7 = arith.mulf %3, %3 : vector<1x128xf32>
    %8 = arith.subf %6, %7 : vector<1x128xf32>
    %cst_6 = arith.constant 0.000000e+00 : f32
    %9 = vector.broadcast %cst_6 : f32 to vector<1x128xf32>
    %10 = arith.maximumf %8, %9 : vector<1x128xf32>
    %c0_7 = arith.constant 0 : index
    %c0_8 = arith.constant 0 : index
    %11 = vector.load %arg5[%c0_7, %c0_8] : memref<1x128xf32, #tpu.memory_space<vmem>>, vector<1x128xf32>
    %cst_9 = arith.constant 9.99999974E-6 : f32
    %12 = vector.broadcast %cst_9 : f32 to vector<1x128xf32>
    %13 = arith.addf %10, %12 : vector<1x128xf32>
    %14 = math.rsqrt %13 : vector<1x128xf32>
    %15 = arith.mulf %11, %14 : vector<1x128xf32>
    %c0_10 = arith.constant 0 : index
    %c0_11 = arith.constant 0 : index
    %16 = vector.load %arg6[%c0_10, %c0_11] : memref<1x128xf32, #tpu.memory_space<vmem>>, vector<1x128xf32>
    %17 = arith.mulf %3, %15 : vector<1x128xf32>
    %18 = arith.subf %16, %17 : vector<1x128xf32>
    %19 = vector.broadcast %15 : vector<1x128xf32> to vector<8x128xf32>
    %20 = arith.mulf %0, %19 : vector<8x128xf32>
    %21 = vector.broadcast %18 : vector<1x128xf32> to vector<8x128xf32>
    %22 = arith.addf %20, %21 : vector<8x128xf32>
    %cst_12 = arith.constant 0.000000e+00 : f32
    %23 = vector.broadcast %cst_12 : f32 to vector<8x128xf32>
    %24 = arith.maximumf %22, %23 : vector<8x128xf32>
    %c0_13 = arith.constant 0 : index
    %c0_14 = arith.constant 0 : index
    %25 = vector.load %arg7[%c0_13, %c0_14] : memref<8x128xf32, #tpu.memory_space<vmem>>, vector<8x128xf32>
    tpu.vector_store %arg7[%c0_13, %c0_14], %24 {strides = array<i32>} : memref<8x128xf32, #tpu.memory_space<vmem>>, vector<8x128xf32>,
    return
  }
  func.func @transform_0(%arg0: i32, %arg1: i32) -> (i32, i32) {
    %c0_i32 = arith.constant 0 : i32
    return %arg0, %arg1 : i32, i32
  }
  func.func @transform_1(%arg0: i32, %arg1: i32) -> (i32, i32) {
    %c0_i32 = arith.constant 0 : i32
    %c0_i32_0 = arith.constant 0 : i32
    return %c0_i32, %arg1 : i32, i32
  }
  func.func @transform_2(%arg0: i32, %arg1: i32) -> (i32, i32) {
    %c0_i32 = arith.constant 0 : i32
    %c0_i32_0 = arith.constant 0 : i32
    return %c0_i32, %arg1 : i32, i32
  }
  func.func @transform_3(%arg0: i32, %arg1: i32) -> (i32, i32) {
    %c0_i32 = arith.constant 0 : i32
    %c0_i32_0 = arith.constant 0 : i32
    return %c0_i32, %arg1 : i32, i32
  }
  func.func @transform_4(%arg0: i32, %arg1: i32) -> (i32, i32) {
    %c0_i32 = arith.constant 0 : i32
    %c0_i32_0 = arith.constant 0 : i32
    return %c0_i32, %arg1 : i32, i32
  }
  func.func @transform_5(%arg0: i32, %arg1: i32) -> (i32, i32) {
    %c0_i32 = arith.constant 0 : i32
    return %arg0, %arg1 : i32, i32
  }
}

</mosaic_0001>

<bundles_post_ra>
// kernel: linear_bn_relu.2
= control target key start
LH: loop header
LB: loop body
LE: loop exit
PB: predicated region body
PF: predicated region fallthrough
CT: control target
= control target key end

     0   :  { %v103_v17 = vmov 0.0   ;;  %s201_s1 = inlined_call_operand.vmem [shape: f32[128,128], index: 1, kind: input, shape index: {}]   ;;  %s202_s0 = inlined_call_operand.vmem [shape: f32[8,128], index: 0, kind: input, shape index: {}]   ;;  %s203_s3 = inlined_call_operand.vmem [shape: f32[1,128], index: 3, kind: output, shape index: {1}]   ;;  %s204_s4 = inlined_call_operand.vmem [shape: f32[1,128], index: 4, kind: output, shape index: {2}]   ;;  %s205_s2 = inlined_call_operand.vmem [shape: f32[8,128], index: 2, kind: output, shape index: {0}]  }
   0x1   :  { %v36_v0 = vld [vmem:[%s201_s1 + $0x78] sm:$0xff]  ;;  %v35_v1 = vld [vmem:[%s201_s1 + $0x70] sm:$0xff]  ;;  %v34_v2 = vld [vmem:[%s201_s1 + $0x68] sm:$0xff]  ;;  %64 = vst [vmem:[%s203_s3] sm:$0x1] %v103_v17 }
   0x2   :  { %37 = vmatpush.msra.mxu0 %v36_v0  ;;  %v33_v3 = vld [vmem:[%s201_s1 + $0x60] sm:$0xff]  ;;  %v32_v4 = vld [vmem:[%s201_s1 + $0x58] sm:$0xff]  ;;  %v31_v5 = vld [vmem:[%s201_s1 + $0x50] sm:$0xff]  ;;  %65 = vst [vmem:[%s204_s4] sm:$0x1] %v103_v17 }
   0x3   :  { %v30_v6 = vld [vmem:[%s201_s1 + $0x48] sm:$0xff]  ;;  %v29_v7 = vld [vmem:[%s201_s1 + $0x40] sm:$0xff]  ;;  %v28_v8 = vld [vmem:[%s201_s1 + $0x38] sm:$0xff] }
   0x4   :  { %38 = vmatpush.msra.mxu0 %v35_v1  ;;  %v27_v9 = vld [vmem:[%s201_s1 + $0x30] sm:$0xff]  ;;  %v26_v10 = vld [vmem:[%s201_s1 + $0x28] sm:$0xff]  ;;  %v25_v11 = vld [vmem:[%s201_s1 + $0x20] sm:$0xff] }
   0x5   :  { %v24_v12 = vld [vmem:[%s201_s1 + $0x18] sm:$0xff]  ;;  %v23_v13 = vld [vmem:[%s201_s1 + $0x10] sm:$0xff]  ;;  %v22_v14 = vld [vmem:[%s201_s1 + $0x8] sm:$0xff] }
   0x6   :  { %39 = vmatpush.msra.mxu0 %v34_v2  ;;  %v21_v15 = vld [vmem:[%s201_s1] sm:$0xff] }
   0x7   :  { %v20_v16 = vld [vmem:[%s202_s0] sm:$0xff] }
   0x8   :  { %40 = vmatpush.msra.mxu0 %v33_v3  ;;  %v71_v29 = vld [vmem:[%s203_s3] sm:$0x1] }
   0x9   :  { %v80_v32 = vld [vmem:[%s204_s4] sm:$0x1] }
   0xa   :  { %41 = vmatpush.msra.mxu0 %v32_v4 }
   0xc   :  { %42 = vmatpush.msra.mxu0 %v31_v5 }
   0xe   :  { %43 = vmatpush.msra.mxu0 %v30_v6 }
  0x10   :  { %44 = vmatpush.msra.mxu0 %v29_v7 }
  0x12   :  { %45 = vmatpush.msra.mxu0 %v28_v8 }
  0x14   :  { %46 = vmatpush.msra.mxu0 %v27_v9 }
  0x16   :  { %47 = vmatpush.msra.mxu0 %v26_v10 }
  0x18   :  { %48 = vmatpush.msra.mxu0 %v25_v11 }
  0x1a   :  { %49 = vmatpush.msra.mxu0 %v24_v12 }
  0x1c   :  { %50 = vmatpush.msra.mxu0 %v23_v13 }
  0x1e   :  { %51 = vmatpush.msra.mxu0 %v22_v14 }
  0x20   :  { %52 = vmatpush.msra.mxu0 %v21_v15 }
  0x21   :  { %53 = vmatmul.f32.vlgmr.msra.gmra.mxu0 %v20_v16 }
  0x9e   :  { %v54_v18 = vpop.f32.mrf.mxu0 }
  0x9f   :  { %70 = vst [vmem:[%s205_s2] sm:$0xff] %v54_v18  ;;  %v72_v19 = vrot.slane %v54_v18, 4  ;;  %v81_v20 = vmul.f32 %v54_v18, %v54_v18 }
  0xa1   :  { %v73_v21 = vadd.f32 %v72_v19, %v54_v18  ;;  %v82_v22 = vrot.slane %v81_v20, 4 }
  0xa3   :  { %v74_v23 = vrot.slane %v73_v21, 2  ;;  %v83_v24 = vadd.f32 %v82_v22, %v81_v20 }
  0xa5   :  { %v75_v25 = vadd.f32 %v74_v23, %v73_v21  ;;  %v84_v26 = vrot.slane %v83_v24, 2 }
  0xa7   :  { %v76_v27 = vrot.slane %v75_v25, 1  ;;  %v85_v28 = vadd.f32 %v84_v26, %v83_v24 }
  0xa9   :  { %v77_v30 = vadd.f32 %v76_v27, %v75_v25  ;;  %v86_v31 = vrot.slane %v85_v28, 1 }
  0xab   :  { %v78_v33 = vadd.f32 %v77_v30, %v71_v29  ;;  %v87_v34 = vadd.f32 %v86_v31, %v85_v28 }
  0xad   :  { %79 = vst [vmem:[%s203_s3] sm:$0x1] %v78_v33  ;;  %v88_v35 = vadd.f32 %v87_v34, %v80_v32 }
  0xaf   :  { %89 = vst [vmem:[%s204_s4] sm:$0x1] %v88_v35 }

// kernel: linear_bn_relu.3
= control target key start
LH: loop header
LB: loop body
LE: loop exit
PB: predicated region body
PF: predicated region fallthrough
CT: control target
= control target key end

     0   :  { %s149_s0 = inlined_call_operand.vmem [shape: f32[8,128], index: 0, kind: input, shape index: {}]   ;;  %s150_s1 = inlined_call_operand.vmem [shape: f32[1,128], index: 1, kind: input, shape index: {}]   ;;  %s151_s2 = inlined_call_operand.vmem [shape: f32[1,128], index: 2, kind: input, shape index: {}]   ;;  %s152_s3 = inlined_call_operand.vmem [shape: f32[1,128], index: 3, kind: input, shape index: {}]   ;;  %s153_s4 = inlined_call_operand.vmem [shape: f32[1,128], index: 4, kind: input, shape index: {}]   ;;  %s154_s5 = inlined_call_operand.hbm [shape: f32[8,128], index: 5, kind: output, shape index: {}]  }
   0x1   :  { %v22_v0 = vld [vmem:[%s150_s1] sm:$0x1] }
   0x2   :  { %v24_v1 = vld [vmem:[%s151_s2] sm:$0x1]  ;;  %v23_v2 = vmul.f32 0.125, %v22_v0 }
   0x3   :  { %v25_v3 = vmul.f32 0.125, %v24_v1 }
   0x4   :  { %10 = vsyncpa [#allocation3], 0  ;;  %v26_v4 = vmul.f32 %v23_v2, %v23_v2  ;;  %v29_v13 = vld [vmem:[%s152_s3] sm:$0x1]  ;;  %s100_s26 = smov [#allocation2]   ;;  %s62_s29 = sshll.u32 %s154_s5, 4  ;;  %s63_s29 = int_to_ptr.hbm [resolvable:$true] %s62_s29 }
   0x5   :  { %v21_v17 = vld [vmem:[%s149_s0] sm:$0xff]  ;;  %s60_s27 = sshll.u32 %s100_s26, 4  ;;  %s61_s27 = int_to_ptr.vmem [resolvable:$true] %s60_s27 }
   0x6   :  { %v27_v5 = vsub.f32 %v25_v3, %v26_v4  ;;  %v42_v18 = vld [vmem:[%s153_s4] sm:$0x1] }
   0x8   :  { %v28_v6 = vmax.f32 %v27_v5, 0.0 }
   0xa   :  { %v30_v7 = vadd.f32 1e-05, %v28_v6 }
   0xc   :  { %72 = vrsqrt.f32 %v30_v7  ;;  %vm37_vm0 = vweird.f32 %v30_v7 }
  0x12   :  { %v73_v8 = vpop.eup %72 }
  0x13   :  { %v32_v9 = vmul.f32 %v73_v8, %v30_v7  ;;  %vm38_vm1 = vweird.f32 %v73_v8 }
  0x14   :  { %vm39_vm2 = vmor %vm37_vm0, %vm38_vm1 }
  0x15   :  { %v33_v10 = vmul.f32 %v73_v8, %v32_v9 }
  0x17   :  { %v34_v11 = vmul.f32 0.5, %v33_v10 }
  0x19   :  { %v35_v12 = vsub.f32 1.5, %v34_v11 }
  0x1b   :  { %v36_v14 = vmul.f32 %v73_v8, %v35_v12 }
  0x1d   :  { %v40_v15 = vsel %vm39_vm2, %v73_v8, %v36_v14 }
  0x1e   :  { %v41_v16 = vmul.f32 %v40_v15, %v29_v13 }
  0x20   :  { %v43_v19 = vmul.f32 %v41_v16, %v23_v2  ;;  %v46_v20 = vperm.slane %v41_v16, 0 }
  0x22   :  { %v44_v21 = vsub.f32 %v42_v18, %v43_v19  ;;  %v48_v22 = vmul.f32 %v46_v20, %v21_v17 }
  0x24   :  { %v50_v23 = vperm.slane %v44_v21, 0 }
  0x26   :  { %v52_v24 = vadd.f32 %v50_v23, %v48_v22 }
  0x28   :  { %v53_v25 = vmax.f32 %v52_v24, 0.0 }
  0x2a   :  { %54 = vst [vmem:[#allocation2] sm:$0xff] %v53_v25 }
  0x2b   :  { %65 = dma.vmem_to_hbm [thread:$0]  %s61_s27, 128, %s63_s29, [#allocation3]  }
  0x2c   :  { %98 = dma.done.wait [#allocation3], 128  }
  0x2d   :  { %99 = vsyncadd [#allocation3], 4294967168 }
  0x2e   :  { %70 = vsyncpa [#allocation3], 1 }

</bundles_post_ra>
